<compile_context>
chip_gen: v6e
topology: v6e:2x2x1
jax: 0.10.0
libtpu: 0.0.40
codegen_flags: <defaults>
</compile_context>

<pallas_src>
import functools

import jax
import jax.numpy as jnp
from jax.experimental import pallas as pl
from jax.experimental.pallas import tpu as pltpu


def _domain_classifier_kernel(x_ref, w1_ref, b1_ref, w2_ref, b2_ref, o_ref):
    # fc1 on the MXU: [bm, D] @ [D, H] -> [bm, H], f32 accumulate.
    h = jnp.dot(x_ref[...], w1_ref[...], preferred_element_type=jnp.float32)
    # Bias + ReLU on the VPU.
    h = jnp.maximum(h + b1_ref[...], 0.0)
    # fc2: contract H against the weight row ('oh,mh->om', q@k^T-style), which
    # yields the tile's logits directly as a lane-dense [1, bm] row, so the
    # store below is a single unmasked, lane-dense vst per grid step.
    logits = jnp.einsum("oh,mh->om", w2_ref[...], h,
                        preferred_element_type=jnp.float32)
    logits = logits + b2_ref[...]
    # Sigmoid on the EUP; one dense [1, block_m] row per grid step.
    o_ref[...] = jax.nn.sigmoid(logits).astype(o_ref.dtype)


_MAX_BLOCK_M = 2048  # x tile = block_m * D * 4 bytes (double-buffered) — tiny vs VMEM


def _pick_block_m(batch):
    """Pick a batch tile size.

    Large tiles amortize the ~0.35us per-grid-step pipeline overhead; VMEM is a
    non-issue at these shapes.  For larger batches keep the tile a multiple of
    128 (lane-dense output row) and leave at least two grid steps so
    dimension_semantics=("parallel",) can shard across v7x's two TensorCores.
    """
    if batch <= 256:
        # One tile covering the whole (8-row padded) batch.
        return max(8, ((batch + 7) // 8) * 8)
    bm = 128
    while bm * 2 <= min(_MAX_BLOCK_M, batch // 2):
        bm *= 2
    return bm


@functools.partial(jax.jit, static_argnames=("block_m", "compute_dtype"))
def domain_classifier_forward(x, w1, b1, w2, b2, *, block_m=None,
                              compute_dtype=None):
    """x: [B, D]; w1: [D, H]; b1: [H]; w2: [H, 1]; b2: [1] -> probs [B, 1]."""
    B, D = x.shape
    H = w1.shape[1]

    if block_m is None:
        block_m = _pick_block_m(B)
    if block_m % 8 != 0:
        raise ValueError("block_m must be a multiple of 8")

    num_blocks = pl.cdiv(B, block_m)
    if num_blocks > 1 and block_m % 128 != 0:
        raise ValueError(
            "block_m must be a multiple of 128 when the batch spans multiple tiles")
    b_padded = num_blocks * block_m

    # Optional bf16 matmul inputs (halves the dominant HBM traffic on v6e/v7x);
    # accumulation (preferred_element_type), biases and sigmoid stay in f32.
    if compute_dtype is not None:
        x = x.astype(compute_dtype)
        w1 = w1.astype(compute_dtype)

    # Pad ragged batches; padded rows are computed independently and sliced away.
    if b_padded != B:
        x = jnp.pad(x, ((0, b_padded - B), (0, 0)))

    b1_row = b1.reshape(1, H).astype(jnp.float32)
    w2_row = w2.reshape(1, H).astype(jnp.float32)  # fc2 weight as a lane-aligned row
    b2_row = b2.reshape(1, 1).astype(jnp.float32)

    cost = pl.CostEstimate(
        flops=2 * b_padded * D * H + 2 * b_padded * H,
        transcendentals=b_padded,  # one sigmoid per row
        bytes_accessed=int(b_padded * D * x.dtype.itemsize
                           + D * H * w1.dtype.itemsize
                           + (2 * H + 1) * 4
                           + b_padded * 4),
    )

    out_row = pl.pallas_call(
        _domain_classifier_kernel,
        out_shape=jax.ShapeDtypeStruct((1, b_padded), jnp.float32),
        grid_spec=pl.GridSpec(
            grid=(num_blocks,),
            in_specs=[
                pl.BlockSpec((block_m, D), lambda i: (i, 0)),  # x tile
                pl.BlockSpec((D, H), lambda i: (0, 0)),        # w1 (VMEM resident)
                pl.BlockSpec((1, H), lambda i: (0, 0)),        # b1
                pl.BlockSpec((1, H), lambda i: (0, 0)),        # w2 row
                pl.BlockSpec((1, 1), lambda i: (0, 0)),        # b2
            ],
            # Lane-dense output: one [1, block_m] row per grid step.
            out_specs=pl.BlockSpec((1, block_m), lambda i: (0, i)),
        ),
        compiler_params=pltpu.CompilerParams(
            dimension_semantics=("parallel",),
        ),
        cost_estimate=cost,
    )(x, w1, b1_row, w2_row, b2_row)

    # Undo the lane-dense layout: (1, B_padded) -> (B, 1).
    return out_row.reshape(b_padded, 1)[:B]


def reference_forward(x, w1, b1, w2, b2):
    h = jnp.maximum(x @ w1 + b1, 0.0)
    return jax.nn.sigmoid(h @ w2 + b2)


if __name__ == "__main__":
    input_size = 32
    hidden = 128  # matches the module-level hidden_size in sentiment.py

    key = jax.random.PRNGKey(0)
    kx, k1, k2, k3, k4, kx2 = jax.random.split(key, 6)

    # PyTorch Linear stores W as [out, in]; we build [in, out] directly since
    # the forward only needs x @ W^T.
    bound1 = 1.0 / (input_size ** 0.5)
    w1 = jax.random.uniform(k1, (input_size, hidden), minval=-bound1,
                            maxval=bound1, dtype=jnp.float32)
    b1 = jax.random.uniform(k2, (hidden,), minval=-bound1, maxval=bound1,
                            dtype=jnp.float32)
    bound2 = 1.0 / (hidden ** 0.5)
    w2 = jax.random.uniform(k3, (hidden, 1), minval=-bound2, maxval=bound2,
                            dtype=jnp.float32)
    b2 = jax.random.uniform(k4, (1,), minval=-bound2, maxval=bound2,
                            dtype=jnp.float32)

    # Small, module-consistent shape (single tile, grid of 1).
    x_small = jax.random.normal(kx, (8, input_size), dtype=jnp.float32)
    out_small = jax.block_until_ready(
        domain_classifier_forward(x_small, w1, b1, w2, b2))
    ref_small = reference_forward(x_small, w1, b1, w2, b2)
    assert out_small.shape == (8, 1)
    assert jnp.allclose(out_small, ref_small, atol=1e-5, rtol=1e-5), \
        "mismatch vs reference (small batch)"

    # Ragged batch: exercises zero-padding + a multi-step grid of lane-dense
    # 128-row tiles (and, on v7x, both TensorCores via the parallel grid axis).
    x_big = jax.random.normal(kx2, (300, input_size), dtype=jnp.float32)
    out_big = jax.block_until_ready(
        domain_classifier_forward(x_big, w1, b1, w2, b2))
    ref_big = reference_forward(x_big, w1, b1, w2, b2)
    assert out_big.shape == (300, 1)
    assert jnp.allclose(out_big, ref_big, atol=1e-5, rtol=1e-5), \
        "mismatch vs reference (ragged batch)"

    print("KERNEL_OK")
</pallas_src>

<mosaic_0001>
module attributes {stable_mosaic.version = 11 : i64} {
  func.func @_domain_classifier_kernel(%arg0: i32, %arg1: memref<8x32xf32, #tpu.memory_space<vmem>>, %arg2: memref<32x128xf32, #tpu.memory_space<vmem>>, %arg3: memref<1x128xf32, #tpu.memory_space<vmem>>, %arg4: memref<1x128xf32, #tpu.memory_space<vmem>>, %arg5: memref<1x1xf32, #tpu.memory_space<vmem>>, %arg6: memref<1x8xf32, #tpu.memory_space<vmem>>) attributes {dimension_semantics = [#tpu.dimension_semantics<parallel>], iteration_bounds = array<i64: 1>, scalar_prefetch = 0 : i64, scratch_operands = 0 : i64, tpu.core_type = #tpu.core_type<tc>, window_params = [{transform_indices = @transform_0, window_bounds = array<i64: 8, 32>}, {pipeline_mode = #tpu.pipeline_mode<synchronous>, transform_indices = @transform_1, window_bounds = array<i64: 32, 128>}, {pipeline_mode = #tpu.pipeline_mode<synchronous>, transform_indices = @transform_2, window_bounds = array<i64: 1, 128>}, {pipeline_mode = #tpu.pipeline_mode<synchronous>, transform_indices = @transform_3, window_bounds = array<i64: 1, 128>}, {pipeline_mode = #tpu.pipeline_mode<synchronous>, transform_indices = @transform_4, window_bounds = array<i64: 1, 1>}, {transform_indices = @transform_5, window_bounds = array<i64: 1, 8>}]} {
    %c0 = arith.constant 0 : index
    %c0_0 = arith.constant 0 : index
    %0 = vector.load %arg1[%c0, %c0_0] : memref<8x32xf32, #tpu.memory_space<vmem>>, vector<8x32xf32>
    %c0_1 = arith.constant 0 : index
    %c0_2 = arith.constant 0 : index
    %1 = vector.load %arg2[%c0_1, %c0_2] : memref<32x128xf32, #tpu.memory_space<vmem>>, vector<32x128xf32>
    %cst = arith.constant dense<0.000000e+00> : vector<8x128xf32>
    %2 = tpu.matmul %0, %1, %cst {dimension_numbers = #tpu.dot_dimension_numbers<[1], [0], [0], [1], [0, 0, 1, 1], [], []>} : vector<8x32xf32>, vector<32x128xf32>, vector<8x128xf32> -> vector<8x128xf32>
    %c0_3 = arith.constant 0 : index
    %c0_4 = arith.constant 0 : index
    %3 = vector.load %arg3[%c0_3, %c0_4] : memref<1x128xf32, #tpu.memory_space<vmem>>, vector<1x128xf32>
    %4 = vector.broadcast %3 : vector<1x128xf32> to vector<8x128xf32>
    %5 = arith.addf %2, %4 : vector<8x128xf32>
    %cst_5 = arith.constant 0.000000e+00 : f32
    %6 = vector.broadcast %cst_5 : f32 to vector<8x128xf32>
    %7 = arith.maximumf %5, %6 : vector<8x128xf32>
    %c0_6 = arith.constant 0 : index
    %c0_7 = arith.constant 0 : index
    %8 = vector.load %arg4[%c0_6, %c0_7] : memref<1x128xf32, #tpu.memory_space<vmem>>, vector<1x128xf32>
    "tpu.trace_start"() <{level = 10 : i32, message = "oh,mh->om"}> : () -> ()
    %cst_8 = arith.constant dense<0.000000e+00> : vector<1x8xf32>
    %9 = tpu.matmul %8, %7, %cst_8 {dimension_numbers = #tpu.dot_dimension_numbers<[1], [1], [0], [0], [0, 0, 1, 0], [], []>} : vector<1x128xf32>, vector<8x128xf32>, vector<1x8xf32> -> vector<1x8xf32>
    "tpu.trace_stop"() : () -> ()
    %c0_9 = arith.constant 0 : index
    %c0_10 = arith.constant 0 : index
    %10 = vector.load %arg5[%c0_9, %c0_10] : memref<1x1xf32, #tpu.memory_space<vmem>>, vector<1x1xf32>
    %11 = vector.broadcast %10 : vector<1x1xf32> to vector<1x8xf32>
    %12 = arith.addf %9, %11 : vector<1x8xf32>
    %13 = arith.negf %12 : vector<1x8xf32>
    %14 = math.exp %13 : vector<1x8xf32>
    %cst_11 = arith.constant 1.000000e+00 : f32
    %15 = vector.broadcast %cst_11 : f32 to vector<1x8xf32>
    %16 = arith.addf %15, %14 : vector<1x8xf32>
    %17 = arith.divf %15, %16 : vector<1x8xf32>
    %c0_12 = arith.constant 0 : index
    %c0_13 = arith.constant 0 : index
    %18 = vector.load %arg6[%c0_12, %c0_13] : memref<1x8xf32, #tpu.memory_space<vmem>>, vector<1x8xf32>
    tpu.vector_store %arg6[%c0_12, %c0_13], %17 {strides = array<i32>} : memref<1x8xf32, #tpu.memory_space<vmem>>, vector<1x8xf32>,
    return
  }
  func.func @transform_0(%arg0: i32) -> (i32, i32) {
    %c0_i32 = arith.constant 0 : i32
    %c0_i32_0 = arith.constant 0 : i32
    return %arg0, %c0_i32 : i32, i32
  }
  func.func @transform_1(%arg0: i32) -> (i32, i32) {
    %c0_i32 = arith.constant 0 : i32
    %c0_i32_0 = arith.constant 0 : i32
    %c0_i32_1 = arith.constant 0 : i32
    return %c0_i32, %c0_i32_0 : i32, i32
  }
  func.func @transform_2(%arg0: i32) -> (i32, i32) {
    %c0_i32 = arith.constant 0 : i32
    %c0_i32_0 = arith.constant 0 : i32
    %c0_i32_1 = arith.constant 0 : i32
    return %c0_i32, %c0_i32_0 : i32, i32
  }
  func.func @transform_3(%arg0: i32) -> (i32, i32) {
    %c0_i32 = arith.constant 0 : i32
    %c0_i32_0 = arith.constant 0 : i32
    %c0_i32_1 = arith.constant 0 : i32
    return %c0_i32, %c0_i32_0 : i32, i32
  }
  func.func @transform_4(%arg0: i32) -> (i32, i32) {
    %c0_i32 = arith.constant 0 : i32
    %c0_i32_0 = arith.constant 0 : i32
    %c0_i32_1 = arith.constant 0 : i32
    return %c0_i32, %c0_i32_0 : i32, i32
  }
  func.func @transform_5(%arg0: i32) -> (i32, i32) {
    %c0_i32 = arith.constant 0 : i32
    %c0_i32_0 = arith.constant 0 : i32
    return %c0_i32, %arg0 : i32, i32
  }
}

</mosaic_0001>

<bundles_post_ra>
// kernel: domain_classifier_forward.1
= control target key start
LH: loop header
LB: loop body
LE: loop exit
PB: predicated region body
PF: predicated region fallthrough
CT: control target
= control target key end

     0   :  { %s402_s0 = inlined_call_operand.hbm [shape: f32[8,32], index: 0, kind: input, shape index: {}]   ;;  %s403_s1 = inlined_call_operand.hbm [shape: f32[32,128], index: 1, kind: input, shape index: {}]   ;;  %s404_s2 = inlined_call_operand.vmem [shape: f32[1,128], index: 2, kind: input, shape index: {}]   ;;  %s405_s3 = inlined_call_operand.vmem [shape: f32[1,128], index: 3, kind: input, shape index: {}]   ;;  %s406_s4 = inlined_call_operand.<no memory space> [shape: f32[1,1], index: 4, kind: input, shape index: {}]   ;;  %s407_s5 = inlined_call_operand.hbm [shape: f32[1,8], index: 5, kind: output, shape index: {}]  }
   0x1   :  { %v10_v0 = vstv %s406_s4 }
   0x2   :  { %11 = vst [vmem:[#allocation2] sm:$0x1] %v10_v0 }
   0x3   :  { %12 = vsyncpa [#allocation4], 0 }
   0x4   :  { %13 = vsyncpa [#allocation7], 0 }
   0x5   :  { %14 = vsyncpa [#allocation5], 0  ;;  %s346_s20 = smov [#allocation3]   ;;  %s347_s22 = smov [#allocation6]  }
   0x6   :  { %s21_s21 = sshll.u32 %s346_s20, 4  ;;  %s30_s23 = sshll.u32 %s347_s22, 4  ;;  %s22_s21 = int_to_ptr.vmem [resolvable:$true] %s21_s21  ;;  %s31_s23 = int_to_ptr.vmem [resolvable:$true] %s30_s23 }
   0x7   :  { %s288_s24 = scalar_lea.vmem %s22_s21, 128  ;;  %p293_p1 = scmp.lt.s32.totalorder %s22_s21, %s22_s21 }
   0x8   :  { %p289_p0 = scmp.ne.s32.totalorder %s22_s21, %s288_s24  ;;  %p294_p2 = scmp.lt.s32.totalorder %s288_s24, %s288_s24 }
   0xa   :  { %p295_p3 = por %p294_p2, %p293_p1 }
   0xc   :  { %p296_p4 = pnand %p295_p3, %p289_p0 }
   0xe   :  { %299 = shalt.err (!%p296_p4)
}
   0xf   :  { %24 = dma.hbm_to_vmem [thread:$0]  %s402_s0, 128, %s22_s21, [#allocation4]  }
  0x10   :  { %s308_s4 = scalar_lea.vmem %s31_s23, 512  ;;  %p313_p6 = scmp.lt.s32.totalorder %s31_s23, %s31_s23 }
  0x11   :  { %p309_p5 = scmp.ne.s32.totalorder %s31_s23, %s308_s4  ;;  %p314_p7 = scmp.lt.s32.totalorder %s308_s4, %s308_s4 }
  0x13   :  { %p315_p8 = por %p314_p7, %p313_p6 }
  0x15   :  { %p316_p9 = pnand %p315_p8, %p309_p5 }
  0x17   :  { %319 = shalt.err (!%p316_p9)
}
  0x18   :  { %s348_s27 = smov 128   ;;  %s349_s28 = smov 8  }
  0x19   :  { %36 = dma.hbm_to_vmem [thread:$0]  %s403_s1, 512, %s31_s23, [#allocation7], %s348_s27, %s348_s27, %s349_s28  }
  0x1a   :  { %340 = dma.done.wait [#allocation4], 128  }
  0x1b   :  { %341 = vsyncadd [#allocation4], 4294967168 }
  0x1c   :  { %342 = dma.done.wait [#allocation7], 512  }
  0x1d   :  { %343 = vsyncadd [#allocation7], 4294966784  ;;  %v350_v1 = vmov 0.0   ;;  %vm351_vm0 = vmmov 0   ;;  %v53_v2 = vld [vmem:[#allocation6 + $0x18] sm:$0xff]  ;;  %v52_v3 = vld [vmem:[#allocation6 + $0x10] sm:$0xff]  ;;  %v143_v15 = vlaneseq }
  0x1e   :  { %251 = vmatprep.subr.mxu0 %v350_v1  ;;  %259 = vmatprep.mubr.msk.f32.mxu0 %vm351_vm0, %v350_v1  ;;  %v51_v4 = vld [vmem:[#allocation6 + $0x8] sm:$0xff]  ;;  %v50_v5 = vld [vmem:[#allocation6] sm:$0xff]  ;;  %v49_v6 = vld [vmem:[#allocation3] sm:$0xff]  ;;  %vm61_vm1 = vcmask 261120   ;;  %v352_v8 = vmov 0   ;;  %vm223_vm2 = vcmask 57344  }
  0x1f   :  { %262 = vmatprep.subr.mxu1 %v350_v1  ;;  %264 = vmatprep.mubr.msk.f32.mxu1 %vm351_vm0, %v350_v1  ;;  %v137_v7 = vld [vmem:[#allocation2] sm:$0x1]  ;;  %v144_v16 = vshrl.u32 %v143_v15, 7 }
  0x20   :  { %252 = vmatpush3.msra.mxu0 %v53_v2  ;;  %275 = vset.pattern.permute.xlu0 %v352_v8  ;;  %v241_v9 = vld [vmem:[%s404_s2] ss:$0 sm:$0xff]  ;;  %s353_s2 = smov [#allocation8]  }
  0x21   :  { %253 = vmatprep.subr.mxu0 %v350_v1  ;;  %140 = vperm.xlu0 %275, %v137_v7   ;;  %v136_v14 = vld [vmem:[%s405_s3] sm:$0x1]  ;;  %v145_v17 = vsub.s32 0, %v144_v16  ;;  %s231_s8 = sshll.u32 %s353_s2, 4  ;;  %s232_s8 = int_to_ptr.vmem [resolvable:$true] %s231_s8 }
  0x22   :  { %254 = vmatpush3.msra.mxu0 %v52_v3  ;;  %s320_s3 = scalar_lea.vmem %s232_s8, 16  ;;  %s324_s9 = scalar_lea.vmem %s232_s8, 32 }
  0x23   :  { %255 = vmatprep.subr.mxu0 %v350_v1  ;;  %p321_p10 = scmp.ne.s32.totalorder %s232_s8, %s320_s3  ;;  %p325_p11 = scmp.lt.s32.totalorder %s232_s8, %s232_s8 }
  0x24   :  { %256 = vmatpush3.msra.mxu0 %v51_v4  ;;  %p326_p12 = scmp.lt.s32.totalorder %s324_s9, %s320_s3 }
  0x25   :  { %257 = vmatprep.subr.mxu0 %v350_v1 }
  0x26   :  { %258 = vmatpush3.msra.mxu0 %v50_v5  ;;  %p327_p13 = por %p326_p12, %p325_p11 }
  0x27   :  { %260 = vmatmul.mubr.msk.f32.vlgmr.msra.gmra.mxu0 %vm61_vm1, %v49_v6 }
  0x28   :  { %p328_p0 = pnand %p327_p13, %p321_p10 }
  0x9c   :  { %v141_v18 = vpop.permute.xlu0 %140 }
  0x9d   :  { %v146_v19 = vrot.slane %v141_v18, %v145_v17 }
  0xe7   :  { %v131_v10 = vpop.f32.mrf.mxu0 }
  0xe8   :  { %v132_v11 = vadd.f32 %v241_v9, %v131_v10 }
  0xe9   :  { %v261_v12 = vpop.f32.mrf.mxu0 }
  0xea   :  { %v135_v13 = vmax.f32 %v132_v11, 0.0 }
  0xec   :  { %263 = vmatpush3.xpose.msra.mxu1 %v135_v13 }
  0xef   :  { %265 = vmatmul.mubr.f32.vlgmr.msra.gmra.mxu1 %v136_v14 }
 0x1af   :  { %v213_v20 = vpop.f32.mrf.mxu1 }
 0x1b0   :  { %v214_v21 = vadd.f32 %v213_v20, %v146_v19 }
 0x1b1   :  { %v266_v22 = vpop.f32.mrf.mxu1 }
 0x1b2   :  { %v243_v23 = vmul.f32 -1.442695, %v214_v21 }
 0x1b4   :  { %276 = vpow2.f32 %v243_v23 }
 0x1c1   :  { %v277_v24 = vpop.eup %276 }
 0x1c2   :  { %v220_v25 = vadd.f32 1.0, %v277_v24 }
 0x1c4   :  { %278 = vrcp.f32 %v220_v25 }
 0x1d1   :  { %v279_v26 = vpop.eup %278 }
 0x1d2   :  { %224 = vst.msk [vmem:[#allocation8] sm:$0x1] %vm223_vm2, %v279_v26 }
 0x1d3   :  { %331 = shalt.err (!%p328_p0)
}
 0x1d4   :  { %234 = dma.vmem_to_hbm [thread:$0]  %s232_s8, 16, %s407_s5, [#allocation5]  }
 0x1d5   :  { %344 = dma.done.wait [#allocation5], 16  }
 0x1d6   :  { %345 = vsyncadd [#allocation5], 4294967280 }
 0x1d7   :  { %238 = vsyncpa [#allocation4], 1 }
 0x1d8   :  { %239 = vsyncpa [#allocation7], 1 }
 0x1d9   :  { %240 = vsyncpa [#allocation5], 1 }

</bundles_post_ra>
